<compile_context>
chip_gen: v7x
topology: tpu7x:2x2x1
jax: 0.10.0
libtpu: 0.0.40
codegen_flags: <defaults>
</compile_context>

<pallas_src>
import functools

import jax
import jax.numpy as jnp
from jax import lax
from jax.experimental import pallas as pl
from jax.experimental.pallas import tpu as pltpu


def _round_up(x, m):
    return (x + m - 1) // m * m


def _supcon_kernel(featq_ref, featc_ref, labr_ref, labc_ref, invc_ref, loss_ref,
                   *, inv_temp, scale, n_valid):
    """One anchor-row block of the SupCon forward.

    featq_ref: [TQ, Dp] bf16   anchor-feature row block
    featc_ref: [Np, Dp] bf16   full contrast features (VMEM-resident)
    labr_ref:  [TQ, 1]  int32  labels of the anchor rows
    labc_ref:  [1, Np]  int32  labels of the contrast columns (VMEM-resident)
    invc_ref:  [TQ, 1]  f32    1 / (#positives per anchor), 0 if no positives
    loss_ref:  [TQ, 1]  f32    per-anchor loss (0 for padded / positive-free rows)
    """
    tq = featq_ref.shape[0]
    np_ = featc_ref.shape[0]

    # Gram block on the MXU: (TQ, Dp) . (Np, Dp)^T, contraction on dim 1 of
    # both operands (no explicit transpose), bf16 inputs, f32 accumulation.
    logits = lax.dot_general(
        featq_ref[...], featc_ref[...],
        dimension_numbers=(((1,), (1,)), ((), ())),
        preferred_element_type=jnp.float32)
    logits = logits * inv_temp

    # Numerical stability.  The row max cancels exactly in the masked
    # log-softmax, so including self / zero-padded columns in it is harmless.
    logits = logits - jnp.max(logits, axis=1, keepdims=True)

    # Self-contrast exclusion (global diagonal) + padded-column exclusion.
    row_base = pl.program_id(0) * tq
    r_ids = lax.broadcasted_iota(jnp.int32, (tq, np_), 0) + row_base
    c_ids = lax.broadcasted_iota(jnp.int32, (tq, np_), 1)
    denom_mask = r_ids != c_ids
    if np_ != n_valid:  # only materialize the extra compare when padding exists
        denom_mask = jnp.logical_and(denom_mask, c_ids < n_valid)

    # Positive-pair mask built in-kernel from the label vectors.
    pos_mask = jnp.logical_and(labr_ref[...] == labc_ref[...], denom_mask)

    exp_l = jnp.where(denom_mask, jnp.exp(logits), 0.0)
    log_denom = jnp.log(jnp.sum(exp_l, axis=1, keepdims=True))
    pos_logit_sum = jnp.sum(jnp.where(pos_mask, logits, 0.0), axis=1,
                            keepdims=True)

    inv_cnt = invc_ref[...]
    # mean log-prob over positives = pos_sum/cnt - log(denom)
    mean_log_prob_pos = pos_logit_sum * inv_cnt - log_denom
    loss_ref[...] = jnp.where(inv_cnt > 0.0, -scale * mean_log_prob_pos, 0.0)


def supcon_loss(features, labels=None, mask=None,
                temperature=0.07, contrast_mode="all", base_temperature=0.07):
    """JAX/Pallas equivalent of SupConLoss.forward (contrast_mode='all')."""
    if features.ndim < 3:
        raise ValueError("`features` needs to be [bsz, n_views, ...]")
    if features.ndim > 3:
        features = features.reshape(features.shape[0], features.shape[1], -1)
    if contrast_mode != "all":
        # TODO(synk): contrast_mode='one' (single-anchor view) not wired up.
        raise ValueError("only contrast_mode='all' implemented")
    if labels is not None and mask is not None:
        raise ValueError("Cannot define both `labels` and `mask`")
    if mask is not None:
        # TODO(synk): arbitrary (possibly asymmetric) user mask path not
        # implemented in the label-vector kernel; only labels / SimCLR paths.
        raise NotImplementedError("explicit `mask` path not implemented")

    bsz, n_views, dim = features.shape

    if labels is None:
        # SimCLR degenerate case: positives are the other views of the same
        # sample -> equivalent to labels = arange(bsz).
        lab = jnp.arange(bsz, dtype=jnp.int32)
    else:
        lab = labels.reshape(-1).astype(jnp.int32)
        if lab.shape[0] != bsz:
            raise ValueError("Num of labels does not match num of features")

    n = n_views * bsz
    tq = min(128, _round_up(n, 8))          # anchor-row tile (sublane aligned)
    np_pad = _round_up(n, tq)               # padded anchor/contrast count
    dp = _round_up(dim, 128)                # lane-aligned feature dim

    # contrast_feature = torch.cat(torch.unbind(features, dim=1), dim=0)
    # -> view-major ordering: index = view * bsz + sample
    cf = jnp.concatenate([features[:, v, :] for v in range(n_views)],
                         axis=0).astype(jnp.float32)             # [n, dim]
    feat = jnp.pad(cf, ((0, np_pad - n), (0, dp - dim)))
    feat = feat.astype(jnp.bfloat16)                             # [Np, Dp]

    lab_t = jnp.tile(lab, n_views)                               # [n]
    lab_pad = jnp.pad(lab_t, (0, np_pad - n))
    lab_row = lab_pad.reshape(np_pad, 1)                         # [Np, 1]
    lab_col = lab_pad.reshape(1, np_pad)                         # [1, Np]

    # Per-anchor positive counts: n_views * |class(label_i)| - 1 (self excluded).
    cls_cnt = jnp.sum(lab[:, None] == lab[None, :], axis=1)      # [bsz]
    pos_cnt = (n_views * cls_cnt - 1).astype(jnp.float32)
    pos_cnt_t = jnp.tile(pos_cnt, n_views)                       # [n]
    inv_cnt = jnp.where(pos_cnt_t > 0, 1.0 / jnp.maximum(pos_cnt_t, 1.0), 0.0)
    inv_cnt = jnp.pad(inv_cnt, (0, np_pad - n)).reshape(np_pad, 1)

    kernel = functools.partial(
        _supcon_kernel,
        inv_temp=float(1.0 / temperature),
        scale=float(temperature / base_temperature),
        n_valid=n)

    per_anchor = pl.pallas_call(
        kernel,
        out_shape=jax.ShapeDtypeStruct((np_pad, 1), jnp.float32),
        grid_spec=pltpu.PrefetchScalarGridSpec(
            num_scalar_prefetch=0,
            grid=(np_pad // tq,),
            in_specs=[
                pl.BlockSpec((tq, dp), lambda i: (i, 0)),       # anchor rows
                pl.BlockSpec((np_pad, dp), lambda i: (0, 0)),   # contrast (resident)
                pl.BlockSpec((tq, 1), lambda i: (i, 0)),        # row labels
                pl.BlockSpec((1, np_pad), lambda i: (0, 0)),    # col labels (resident)
                pl.BlockSpec((tq, 1), lambda i: (i, 0)),        # 1 / pos_cnt
            ],
            out_specs=pl.BlockSpec((tq, 1), lambda i: (i, 0)),
        ),
        compiler_params=pltpu.CompilerParams(
            dimension_semantics=("parallel",),
            vmem_limit_bytes=64 * 1024 * 1024),
    )(feat, feat, lab_row, lab_col, inv_cnt)

    # loss.view(anchor_count, batch_size).mean() == mean over all N anchors.
    return jnp.sum(per_anchor[:n, 0]) / jnp.float32(n)


def _reference_supcon(features, labels, temperature=0.07, base_temperature=0.07,
                      feat_dtype=jnp.float32):
    """Pure-JAX reference (torch semantics); feat_dtype mimics bf16 rounding."""
    bsz, n_views, _ = features.shape
    lab = labels.reshape(-1)
    mask = (lab[:, None] == lab[None, :]).astype(jnp.float32)
    cf = jnp.concatenate([features[:, v, :] for v in range(n_views)], axis=0)
    cf = cf.astype(feat_dtype).astype(jnp.float32)
    logits = jnp.matmul(cf, cf.T, precision=lax.Precision.HIGHEST) / temperature
    logits = logits - jnp.max(logits, axis=1, keepdims=True)
    n = n_views * bsz
    logits_mask = 1.0 - jnp.eye(n, dtype=jnp.float32)
    mask = jnp.tile(mask, (n_views, n_views)) * logits_mask
    exp_logits = jnp.exp(logits) * logits_mask
    log_prob = logits - jnp.log(exp_logits.sum(1, keepdims=True))
    mean_log_prob_pos = (mask * log_prob).sum(1) / mask.sum(1)
    loss = -(temperature / base_temperature) * mean_log_prob_pos
    return loss.mean()


if __name__ == "__main__":
    key = jax.random.PRNGKey(0)
    k_feat, k_lab = jax.random.split(key)

    bsz, n_views, dim = 8, 2, 32
    feats = jax.random.normal(k_feat, (bsz, n_views, dim), dtype=jnp.float32)
    feats = feats / jnp.linalg.norm(feats, axis=-1, keepdims=True)
    labels = jax.random.randint(k_lab, (bsz,), 0, 4)

    # Supervised path.
    loss = jax.block_until_ready(supcon_loss(feats, labels=labels))
    ref_bf16 = _reference_supcon(feats, labels, feat_dtype=jnp.bfloat16)
    ref_f32 = _reference_supcon(feats, labels)
    assert jnp.allclose(loss, ref_bf16, rtol=1e-3, atol=1e-3), (loss, ref_bf16)
    assert jnp.allclose(loss, ref_f32, rtol=3e-2, atol=3e-2), (loss, ref_f32)

    # SimCLR (unsupervised) path.
    loss_u = jax.block_until_ready(supcon_loss(feats))
    simclr_labels = jnp.arange(bsz, dtype=jnp.int32)
    ref_u = _reference_supcon(feats, simclr_labels, feat_dtype=jnp.bfloat16)
    assert jnp.allclose(loss_u, ref_u, rtol=1e-3, atol=1e-3), (loss_u, ref_u)

    print("KERNEL_OK")
</pallas_src>

<mosaic_0001>
module attributes {stable_mosaic.version = 11 : i64} {
  func.func @_supcon_kernel(%arg0: i32, %arg1: memref<16x128xbf16, #tpu.memory_space<vmem>>, %arg2: memref<16x128xbf16, #tpu.memory_space<vmem>>, %arg3: memref<16x1xi32, #tpu.memory_space<vmem>>, %arg4: memref<1x16xi32, #tpu.memory_space<vmem>>, %arg5: memref<16x1xf32, #tpu.memory_space<vmem>>, %arg6: memref<16x1xf32, #tpu.memory_space<vmem>>) attributes {dimension_semantics = [#tpu.dimension_semantics<parallel>], iteration_bounds = array<i64: 1>, scalar_prefetch = 0 : i64, scratch_operands = 0 : i64, tpu.core_type = #tpu.core_type<tc>, window_params = [{transform_indices = @transform_0, window_bounds = array<i64: 16, 128>}, {pipeline_mode = #tpu.pipeline_mode<synchronous>, transform_indices = @transform_1, window_bounds = array<i64: 16, 128>}, {transform_indices = @transform_2, window_bounds = array<i64: 16, 1>}, {pipeline_mode = #tpu.pipeline_mode<synchronous>, transform_indices = @transform_3, window_bounds = array<i64: 1, 16>}, {transform_indices = @transform_4, window_bounds = array<i64: 16, 1>}, {transform_indices = @transform_5, window_bounds = array<i64: 16, 1>}]} {
    %c0 = arith.constant 0 : index
    %c0_0 = arith.constant 0 : index
    %0 = vector.load %arg1[%c0, %c0_0] : memref<16x128xbf16, #tpu.memory_space<vmem>>, vector<16x128xbf16>
    %c0_1 = arith.constant 0 : index
    %c0_2 = arith.constant 0 : index
    %1 = vector.load %arg2[%c0_1, %c0_2] : memref<16x128xbf16, #tpu.memory_space<vmem>>, vector<16x128xbf16>
    %cst = arith.constant dense<0.000000e+00> : vector<16x16xf32>
    %2 = tpu.matmul %0, %1, %cst {dimension_numbers = #tpu.dot_dimension_numbers<[1], [1], [0], [0], [0, 0, 1, 0], [], []>} : vector<16x128xbf16>, vector<16x128xbf16>, vector<16x16xf32> -> vector<16x16xf32>
    %cst_3 = arith.constant 14.2857141 : f32
    %3 = vector.broadcast %cst_3 : f32 to vector<16x16xf32>
    %4 = arith.mulf %2, %3 : vector<16x16xf32>
    %cst_4 = arith.constant dense<0xFF800000> : vector<16xf32>
    %5 = vector.multi_reduction <maximumf>, %4, %cst_4 [1] : vector<16x16xf32> to vector<16xf32>
    %6 = vector.shape_cast %5 : vector<16xf32> to vector<16x1xf32>
    %7 = vector.broadcast %6 : vector<16x1xf32> to vector<16x16xf32>
    %8 = arith.subf %4, %7 : vector<16x16xf32>
    %c16_i32 = arith.constant 16 : i32
    %9 = arith.muli %arg0, %c16_i32 : i32
    %10 = tpu.iota {dimensions = array<i32: 0>} : vector<16x16xi32>
    %11 = vector.broadcast %9 : i32 to vector<16x16xi32>
    %12 = arith.addi %10, %11 : vector<16x16xi32>
    %13 = tpu.iota {dimensions = array<i32: 1>} : vector<16x16xi32>
    %14 = arith.cmpi ne, %12, %13 : vector<16x16xi32>
    %c0_5 = arith.constant 0 : index
    %c0_6 = arith.constant 0 : index
    %15 = vector.load %arg3[%c0_5, %c0_6] : memref<16x1xi32, #tpu.memory_space<vmem>>, vector<16x1xi32>
    %c0_7 = arith.constant 0 : index
    %c0_8 = arith.constant 0 : index
    %16 = vector.load %arg4[%c0_7, %c0_8] : memref<1x16xi32, #tpu.memory_space<vmem>>, vector<1x16xi32>
    %17 = vector.broadcast %15 : vector<16x1xi32> to vector<16x16xi32>
    %18 = vector.broadcast %16 : vector<1x16xi32> to vector<16x16xi32>
    %19 = arith.cmpi eq, %17, %18 : vector<16x16xi32>
    %20 = arith.andi %19, %14 : vector<16x16xi1>
    %21 = math.exp %8 : vector<16x16xf32>
    %cst_9 = arith.constant 0.000000e+00 : f32
    %22 = vector.broadcast %cst_9 : f32 to vector<16x16xf32>
    %23 = arith.select %14, %21, %22 : vector<16x16xi1>, vector<16x16xf32>
    %cst_10 = arith.constant dense<0.000000e+00> : vector<16xf32>
    %24 = vector.multi_reduction <add>, %23, %cst_10 [1] : vector<16x16xf32> to vector<16xf32>
    %25 = vector.shape_cast %24 : vector<16xf32> to vector<16x1xf32>
    %26 = math.log %25 : vector<16x1xf32>
    %cst_11 = arith.constant 0.000000e+00 : f32
    %27 = vector.broadcast %cst_11 : f32 to vector<16x16xf32>
    %28 = arith.select %20, %8, %27 : vector<16x16xi1>, vector<16x16xf32>
    %cst_12 = arith.constant dense<0.000000e+00> : vector<16xf32>
    %29 = vector.multi_reduction <add>, %28, %cst_12 [1] : vector<16x16xf32> to vector<16xf32>
    %30 = vector.shape_cast %29 : vector<16xf32> to vector<16x1xf32>
    %c0_13 = arith.constant 0 : index
    %c0_14 = arith.constant 0 : index
    %31 = vector.load %arg5[%c0_13, %c0_14] : memref<16x1xf32, #tpu.memory_space<vmem>>, vector<16x1xf32>
    %32 = arith.mulf %30, %31 : vector<16x1xf32>
    %33 = arith.subf %32, %26 : vector<16x1xf32>
    %cst_15 = arith.constant 0.000000e+00 : f32
    %34 = vector.broadcast %cst_15 : f32 to vector<16x1xf32>
    %35 = arith.cmpf ogt, %31, %34 : vector<16x1xf32>
    %cst_16 = arith.constant -1.000000e+00 : f32
    %36 = vector.broadcast %cst_16 : f32 to vector<16x1xf32>
    %37 = arith.mulf %36, %33 : vector<16x1xf32>
    %cst_17 = arith.constant 0.000000e+00 : f32
    %38 = vector.broadcast %cst_17 : f32 to vector<16x1xf32>
    %39 = arith.select %35, %37, %38 : vector<16x1xi1>, vector<16x1xf32>
    %c0_18 = arith.constant 0 : index
    %c0_19 = arith.constant 0 : index
    %40 = vector.load %arg6[%c0_18, %c0_19] : memref<16x1xf32, #tpu.memory_space<vmem>>, vector<16x1xf32>
    tpu.vector_store %arg6[%c0_18, %c0_19], %39 {strides = array<i32>} : memref<16x1xf32, #tpu.memory_space<vmem>>, vector<16x1xf32>,
    return
  }
  func.func @transform_0(%arg0: i32) -> (i32, i32) {
    %c0_i32 = arith.constant 0 : i32
    %c0_i32_0 = arith.constant 0 : i32
    return %arg0, %c0_i32 : i32, i32
  }
  func.func @transform_1(%arg0: i32) -> (i32, i32) {
    %c0_i32 = arith.constant 0 : i32
    %c0_i32_0 = arith.constant 0 : i32
    %c0_i32_1 = arith.constant 0 : i32
    return %c0_i32, %c0_i32_0 : i32, i32
  }
  func.func @transform_2(%arg0: i32) -> (i32, i32) {
    %c0_i32 = arith.constant 0 : i32
    %c0_i32_0 = arith.constant 0 : i32
    return %arg0, %c0_i32 : i32, i32
  }
  func.func @transform_3(%arg0: i32) -> (i32, i32) {
    %c0_i32 = arith.constant 0 : i32
    %c0_i32_0 = arith.constant 0 : i32
    %c0_i32_1 = arith.constant 0 : i32
    return %c0_i32, %c0_i32_0 : i32, i32
  }
  func.func @transform_4(%arg0: i32) -> (i32, i32) {
    %c0_i32 = arith.constant 0 : i32
    %c0_i32_0 = arith.constant 0 : i32
    return %arg0, %c0_i32 : i32, i32
  }
  func.func @transform_5(%arg0: i32) -> (i32, i32) {
    %c0_i32 = arith.constant 0 : i32
    %c0_i32_0 = arith.constant 0 : i32
    return %arg0, %c0_i32 : i32, i32
  }
}

</mosaic_0001>

<bundles_post_ra>
// kernel: tpu_custom_call.1
= control target key start
LH: loop header
LB: loop body
LE: loop exit
PB: predicated region body
PF: predicated region fallthrough
CT: control target
= control target key end

     0   :  { %10 = vsyncpa [#allocation3], 0  ;;  %s569_s0 = inlined_call_operand.hbm [shape: bf16[16,128], index: 0, kind: input, shape index: {}]   ;;  %s570_s1 = inlined_call_operand.hbm [shape: bf16[16,128], index: 1, kind: input, shape index: {}]   ;;  %s571_s2 = inlined_call_operand.hbm [shape: s32[16,1], index: 2, kind: input, shape index: {}]   ;;  %s572_s3 = inlined_call_operand.hbm [shape: s32[1,16], index: 3, kind: input, shape index: {}]   ;;  %s573_s4 = inlined_call_operand.hbm [shape: f32[16,1], index: 4, kind: input, shape index: {}]   ;;  %s574_s5 = inlined_call_operand.hbm [shape: f32[16,1], index: 5, kind: output, shape index: {}]  }
   0x1   :  { %11 = vsyncpa [#allocation6], 0 }
   0x2   :  { %12 = vsyncpa [#allocation9], 0 }
   0x3   :  { %13 = vsyncpa [#allocation4], 0  ;;  %s418_s18 = smov [#allocation5]   ;;  %s419_s20 = smov [#allocation8]  }
   0x4   :  { %s31_s19 = sshll.u32 %s418_s18, 4  ;;  %s56_s21 = sshll.u32 %s419_s20, 4  ;;  %s32_s19 = int_to_ptr.vmem [resolvable:$true] %s31_s19  ;;  %s461_s21 = int_to_ptr.vmem [resolvable:$true] %s56_s21 }
   0x5   :  { %s278_s24 = scalar_lea.hbm %s570_s1, 128 }
   0x6   :  { %p279_p0 = scmp.ne.s32.totalorder %s570_s1, %s278_s24  ;;  %p282_p1 = scmp.lt.u32.totalorder %s278_s24, %s570_s1 }
   0x8   :  { %p284_p2 = pnand %p282_p1, %p279_p0 }
   0xa   :  { %287 = shalt.err (!%p284_p2)
}
   0xb   :  { %s288_s29 = scalar_lea.vmem %s32_s19, 128  ;;  %p293_p4 = scmp.lt.s32.totalorder %s32_s19, %s32_s19 }
   0xc   :  { %p289_p3 = scmp.ne.s32.totalorder %s32_s19, %s288_s29  ;;  %p294_p5 = scmp.lt.s32.totalorder %s288_s29, %s288_s29 }
   0xe   :  { %p295_p6 = por %p294_p5, %p293_p4 }
  0x10   :  { %p296_p7 = pnand %p295_p6, %p289_p3 }
  0x12   :  { %299 = shalt.err (!%p296_p7)
}
  0x13   :  { %s420_s30 = smov 64   ;;  %s421_s6 = smov 4  }
  0x14   :  { %37 = dma.hbm_to_vmem [thread:$0]  %s570_s1, 128, %s32_s19, [#allocation6], %s420_s30, %s420_s30, %s421_s6  }
  0x15   :  { %s300_s11 = scalar_lea.hbm %s572_s3, 16 }
  0x16   :  { %p301_p8 = scmp.ne.s32.totalorder %s572_s3, %s300_s11  ;;  %p304_p9 = scmp.lt.u32.totalorder %s300_s11, %s572_s3 }
  0x18   :  { %p306_p10 = pnand %p304_p9, %p301_p8 }
  0x1a   :  { %309 = shalt.err (!%p306_p10)
}
  0x1b   :  { %s310_s16 = scalar_lea.vmem %s461_s21, 16  ;;  %s314_s1 = scalar_lea.vmem %s461_s21, 32 }
  0x1c   :  { %p311_p11 = scmp.ne.s32.totalorder %s461_s21, %s310_s16  ;;  %p315_p12 = scmp.lt.s32.totalorder %s461_s21, %s461_s21 }
  0x1d   :  { %p316_p13 = scmp.lt.s32.totalorder %s314_s1, %s310_s16 }
  0x1f   :  { %p317_p0 = por %p316_p13, %p315_p12 }
  0x21   :  { %p318_p1 = pnand %p317_p0, %p311_p11 }
  0x23   :  { %321 = shalt.err (!%p318_p1)
}
  0x24   :  { %59 = dma.hbm_to_vmem [thread:$0]  %s572_s3, 16, %s461_s21, [#allocation9]  }
  0x25   :  { %s422_s19 = smov [#allocation2]   ;;  %s423_s22 = smov [#allocation7]  }
  0x26   :  { %s19_s20 = sshll.u32 %s422_s19, 4  ;;  %s43_s23 = sshll.u32 %s423_s22, 4  ;;  %s20_s20 = int_to_ptr.vmem [resolvable:$true] %s19_s20  ;;  %s496_s23 = int_to_ptr.vmem [resolvable:$true] %s43_s23 }
  0x27   :  { %s322_s26 = scalar_lea.hbm %s569_s0, 128 }
  0x28   :  { %p323_p2 = scmp.ne.s32.totalorder %s569_s0, %s322_s26  ;;  %p326_p3 = scmp.lt.u32.totalorder %s322_s26, %s569_s0 }
  0x2a   :  { %p328_p4 = pnand %p326_p3, %p323_p2 }
  0x2c   :  { %331 = shalt.err (!%p328_p4)
}
  0x2d   :  { %s332_s3 = scalar_lea.vmem %s20_s20, 128  ;;  %p337_p6 = scmp.lt.s32.totalorder %s20_s20, %s20_s20 }
  0x2e   :  { %p333_p5 = scmp.ne.s32.totalorder %s20_s20, %s332_s3  ;;  %p338_p7 = scmp.lt.s32.totalorder %s332_s3, %s332_s3 }
  0x30   :  { %p339_p8 = por %p338_p7, %p337_p6 }
  0x32   :  { %p340_p9 = pnand %p339_p8, %p333_p5 }
  0x34   :  { %343 = shalt.err (!%p340_p9)
}
  0x35   :  { %25 = dma.hbm_to_vmem [thread:$0]  %s569_s0, 128, %s20_s20, [#allocation3], %s420_s30, %s420_s30, %s421_s6  }
  0x36   :  { %s344_s11 = scalar_lea.hbm %s571_s2, 256 }
  0x37   :  { %p345_p10 = scmp.ne.s32.totalorder %s571_s2, %s344_s11  ;;  %p348_p11 = scmp.lt.u32.totalorder %s344_s11, %s571_s2 }
  0x39   :  { %p350_p12 = pnand %p348_p11, %p345_p10 }
  0x3b   :  { %353 = shalt.err (!%p350_p12)
}
  0x3c   :  { %s354_s16 = scalar_lea.vmem %s496_s23, 256  ;;  %p359_p0 = scmp.lt.s32.totalorder %s496_s23, %s496_s23 }
  0x3d   :  { %p355_p13 = scmp.ne.s32.totalorder %s496_s23, %s354_s16  ;;  %p360_p1 = scmp.lt.s32.totalorder %s354_s16, %s354_s16 }
  0x3f   :  { %p361_p2 = por %p360_p1, %p359_p0 }
  0x41   :  { %p362_p3 = pnand %p361_p2, %p355_p13 }
  0x43   :  { %365 = shalt.err (!%p362_p3)
}
  0x44   :  { %s424_s0 = smov 128   ;;  %s425_s30 = smov 8  }
  0x45   :  { %49 = dma.hbm_to_vmem [thread:$0]  %s571_s2, 256, %s496_s23, [#allocation6], %s424_s0, %s424_s0, %s425_s30  }
  0x46   :  { %s426_s17 = smov [#allocation10]   ;;  %s366_s22 = scalar_lea.hbm %s573_s4, 256 }
  0x47   :  { %s65_s18 = sshll.u32 %s426_s17, 4  ;;  %p367_p4 = scmp.ne.s32.totalorder %s573_s4, %s366_s22  ;;  %s66_s18 = int_to_ptr.vmem [resolvable:$true] %s65_s18 }
  0x48   :  { %p370_p5 = scmp.lt.u32.totalorder %s366_s22, %s573_s4 }
  0x4a   :  { %p372_p6 = pnand %p370_p5, %p367_p4 }
  0x4c   :  { %375 = shalt.err (!%p372_p6)
}
  0x4d   :  { %s376_s28 = scalar_lea.vmem %s66_s18, 256  ;;  %p381_p8 = scmp.lt.s32.totalorder %s66_s18, %s66_s18 }
  0x4e   :  { %p377_p7 = scmp.ne.s32.totalorder %s66_s18, %s376_s28  ;;  %p382_p9 = scmp.lt.s32.totalorder %s376_s28, %s376_s28 }
  0x50   :  { %p383_p10 = por %p382_p9, %p381_p8 }
  0x52   :  { %p384_p11 = pnand %p383_p10, %p377_p7 }
  0x54   :  { %387 = shalt.err (!%p384_p11)
}
  0x55   :  { %71 = dma.hbm_to_vmem [thread:$0]  %s573_s4, 256, %s66_s18, [#allocation9], %s424_s0, %s424_s0, %s425_s30  }
  0x56   :  { %410 = dma.done.wait [#allocation3], 128  }
  0x57   :  { %411 = vsyncadd [#allocation3], 4294967168 }
  0x58   :  { %412 = dma.done.wait [#allocation6], 384  }
  0x59   :  { %413 = vsyncadd [#allocation6], 4294966912 }
  0x5a   :  { %414 = dma.done.wait [#allocation9], 272  }
  0x5b   :  { %415 = vsyncadd [#allocation9], 4294967024  ;;  %v427_v0 = vmov 0.0   ;;  %vm428_vm0 = vmmov 0   ;;  %v268_v1 = vld [vmem:[#allocation5] sm:$0xff]   ;;  %v269_v2 = vld [vmem:[#allocation2] sm:$0xff]   ;;  %v157_v17 = vlaneseq }
  0x5c   :  { %247 = vmatprep.subr.bf16.mxu0 %v427_v0  ;;  %249 = vmatprep.mubr.msk.bf16.mxu0 %vm428_vm0, %v427_v0  ;;  %v167_v3 = vld [vmem:[#allocation7] sm:$0xff]  ;;  %v429_v4 = vmov 0   ;;  %v168_v5 = vld [vmem:[#allocation7 + $0x8] sm:$0xff]  ;;  %vm147_vm1 = vcmask 130048   ;;  %v244_v24 = vld [vmem:[#allocation8] ss:$0 sm:$0xff] }
  0x5d   :  { %248 = vmatpush3.bf16.xpose.msra.mxu0 %v268_v1  ;;  %266 = vset.pattern.permute.xlu1 %v429_v4  ;;  %v158_v22 = vshrl.u32 %v157_v17, 7  ;;  %v164_v23 = vand.u32 127, %v157_v17  ;;  %v208_v40 = vld [vmem:[#allocation10] sm:$0xff]  ;;  %v209_v44 = vld [vmem:[#allocation10 + $0x8] sm:$0xff]  ;;  %vm220_vm9 = vcmask 7168   ;;  %s430_s4 = smov [#allocation11]  }
  0x5e   :  { %267 = vset.pattern.permute.xlu0 %v429_v4  ;;  %171 = vperm.xlu1 %266, %v167_v3   ;;  %vm214_vm8 = vcmp.gt.f32.partialorder %v208_v40, 0.0  ;;  %s228_s29 = sshll.u32 %s430_s4, 4  ;;  %vm215_vm10 = vcmp.gt.f32.partialorder %v209_v44, 0.0  ;;  %s229_s29 = int_to_ptr.vmem [resolvable:$true] %s228_s29 }
  0x5f   :  { %vm165_vm2 = vcmp.ne.s32.totalorder %v158_v22, %v164_v23  ;;  %v159_v25 = vadd.s32 8, %v158_v22  ;;  %s388_s7 = scalar_lea.vmem %s229_s29, 256  ;;  %p393_p13 = scmp.lt.s32.totalorder %s229_s29, %s229_s29 }
  0x60   :  { %p389_p12 = scmp.ne.s32.totalorder %s229_s29, %s388_s7  ;;  %p394_p0 = scmp.lt.s32.totalorder %s388_s7, %s388_s7 }
  0x61   :  { %vm166_vm5 = vcmp.ne.s32.totalorder %v159_v25, %v164_v23 }
  0x62   :  { %174 = vperm.xlu1 %266, %v168_v5   ;;  %p395_p1 = por %p394_p0, %p393_p13 }
  0x64   :  { %250 = vmatmul.mubr.bf16.vlgmr.msra.gmra.mrb[0].mxu0 %v269_v2  ;;  %p396_p2 = pnand %p395_p1, %p389_p12 }
  0xdd   :  { %v172_v20 = vpop.permute.xlu1 %171 }
  0xde   :  { %vm180_vm3 = vcmp.eq.s32.totalorder %v172_v20, %v244_v24 }
  0xdf   :  { %vm182_vm4 = vmand %vm180_vm3, %vm165_vm2 }
  0xe1   :  { %v175_v26 = vpop.permute.xlu1 %174 }
  0xe2   :  { %vm181_vm6 = vcmp.eq.s32.totalorder %v175_v26, %v244_v24 }
  0xe3   :  { %vm183_vm7 = vmand %vm181_vm6, %vm166_vm5 }
 0x137   :  { %v138_v6 = vpop.f32.mrb[0].mxu0 }
 0x138   :  { %v145_v7 = vmul.f32 14.285714, %v138_v6  ;;  %v251_v8 = vpop.f32.mrb[1].mxu0 }
 0x139   :  { %v141_v9 = vpop.f32.mrb[2].mxu0 }
 0x13a   :  { %v146_v10 = vmul.f32 14.285714, %v141_v9  ;;  %v252_v11 = vpop.f32.mrb[3].mxu0  ;;  %v148_v12 = vsel %vm147_vm1, %v145_v7, -inf }
 0x13b   :  { %149 = vmax.xlane.f32.xlu0 %v148_v12 }
 0x13c   :  { %v151_v13 = vsel %vm147_vm1, %v146_v10, -inf }
 0x13f   :  { %152 = vmax.xlane.f32.xlu0 %v151_v13 }
 0x1c8   :  { %v150_v14 = vpop.xlane.xlu0 %149 }
 0x1c9   :  { %v154_v15 = vsub.f32 %v145_v7, %v150_v14 }
 0x1cb   :  { %v184_v16 = vmul.f32 1.442695, %v154_v15  ;;  %v200_v30 = vsel %vm182_vm4, %v154_v15, 0.0 }
 0x1cc   :  { %v153_v18 = vpop.xlane.xlu0 %152  ;;  %v202_v33 = vsel %vm147_vm1, %v200_v30, 0.0 }
 0x1cd   :  { %270 = vpow2.f32 %v184_v16  ;;  %v155_v19 = vsub.f32 %v146_v10, %v153_v18 }
 0x1cf   :  { %v186_v21 = vmul.f32 1.442695, %v155_v19  ;;  %v201_v35 = vsel %vm183_vm7, %v155_v19, 0.0 }
 0x1d0   :  { %v205_v36 = vsel %vm147_vm1, %v201_v35, 0.0 }
 0x1d1   :  { %272 = vpow2.f32 %v186_v21 }
 0x1d7   :  { %v271_v27 = vpop.eup %270 }
 0x1d8   :  { %v188_v28 = vsel %vm165_vm2, %v271_v27, 0.0 }
 0x1d9   :  { %v190_v29 = vsel %vm147_vm1, %v188_v28, 0.0 }
 0x1da   :  { %191 = vadd.xlane.f32.xlu0 %v190_v29 }
 0x1db   :  { %v273_v31 = vpop.eup %272 }
 0x1dc   :  { %v189_v32 = vsel %vm166_vm5, %v273_v31, 0.0 }
 0x1dd   :  { %v193_v34 = vsel %vm147_vm1, %v189_v32, 0.0 }
 0x1de   :  { %203 = vadd.xlane.f32.xlu0 %v202_v33  ;;  %194 = vadd.xlane.f32.xlu1 %v193_v34 }
 0x1e2   :  { %206 = vadd.xlane.f32.xlu0 %v205_v36 }
 0x267   :  { %v192_v37 = vpop.xlane.xlu0 %191 }
 0x268   :  { %274 = vlog2.f32 %v192_v37 }
 0x26b   :  { %v195_v38 = vpop.xlane.xlu1 %194  ;;  %v204_v39 = vpop.xlane.xlu0 %203 }
 0x26c   :  { %276 = vlog2.f32 %v195_v38  ;;  %v210_v43 = vmul.f32 %v208_v40, %v204_v39 }
 0x26f   :  { %v207_v45 = vpop.xlane.xlu0 %206 }
 0x270   :  { %v211_v50 = vmul.f32 %v209_v44, %v207_v45 }
 0x272   :  { %v275_v41 = vpop.eup %274 }
 0x273   :  { %v197_v42 = vmul.f32 0.6931472, %v275_v41 }
 0x275   :  { %v212_v46 = vsub.f32 %v210_v43, %v197_v42 }
 0x276   :  { %v277_v47 = vpop.eup %276 }
 0x277   :  { %v199_v48 = vmul.f32 0.6931472, %v277_v47  ;;  %v216_v49 = vmul.f32 -1.0, %v212_v46 }
 0x279   :  { %v218_v51 = vsel %vm214_vm8, %v216_v49, 0.0  ;;  %v213_v52 = vsub.f32 %v211_v50, %v199_v48 }
 0x27a   :  { %221 = vst.msk [vmem:[#allocation11] sm:$0xff] %vm220_vm9, %v218_v51 }
 0x27b   :  { %v217_v53 = vmul.f32 -1.0, %v213_v52 }
 0x27d   :  { %v219_v54 = vsel %vm215_vm10, %v217_v53, 0.0 }
 0x27e   :  { %222 = vst.msk [vmem:[#allocation11 + $0x8] sm:$0xff] %vm220_vm9, %v219_v54 }
 0x27f   :  { %399 = shalt.err (!%p396_p2)
}
 0x280   :  { %s400_s8 = scalar_lea.hbm %s574_s5, 256 }
 0x281   :  { %p401_p3 = scmp.ne.s32.totalorder %s574_s5, %s400_s8  ;;  %p404_p4 = scmp.lt.u32.totalorder %s400_s8, %s574_s5 }
 0x283   :  { %p406_p5 = pnand %p404_p4, %p401_p3 }
 0x285   :  { %409 = shalt.err (!%p406_p5)
}
 0x286   :  { %234 = dma.vmem_to_hbm [thread:$0]  %s229_s29, 256, %s574_s5, [#allocation4], %s424_s0, %s424_s0, %s425_s30  }
 0x287   :  { %416 = dma.done.wait [#allocation4], 256  }
 0x288   :  { %417 = vsyncadd [#allocation4], 4294967040 }
 0x289   :  { %238 = vsyncpa [#allocation3], 1 }
 0x28a   :  { %239 = vsyncpa [#allocation6], 1 }
 0x28b   :  { %240 = vsyncpa [#allocation9], 1 }
 0x28c   :  { %241 = vsyncpa [#allocation4], 1 }

</bundles_post_ra>
